<compile_context>
chip_gen: v7x
topology: tpu7x:2x2x1
jax: 0.10.0
libtpu: 0.0.40
codegen_flags: <defaults>
</compile_context>

<pallas_src>
import math
from collections import namedtuple

import jax
import jax.numpy as jnp
from jax.experimental import pallas as pl
from jax.experimental.pallas import tpu as pltpu


LayerMeta = namedtuple("LayerMeta", ["K", "pad", "P", "L_in", "L_out", "Cin_p", "Cout_p", "seg"])


def _round_up(n, m):
    return ((n + m - 1) // m) * m


def prepare_params(params, input_dim, num_timestamps):
    """One-time conversion of PyTorch-layout weights into kernel layouts (done once, not per call).

    conv w (Cout, Cin, K) -> (K, Cin_p, Cout_p) bf16, Cout zero-padded to 128 lanes.
    fc   w (O, C*L)       -> (L*C_p, O_p) bf16, permuted so the kernel's lane-dense, time-major,
                             channels-last feature slab matches torch.flatten(NCL, 1); O padded
                             to 128 (zero columns) for a lane-dense output store.
    """
    prep = {"conv_w": [], "conv_b": [], "meta": []}
    L = num_timestamps
    cin_real, cin_pad = input_dim, input_dim
    for (w, b, pool) in params["conv"]:
        cout, cin_l, K = w.shape
        assert cin_l == cin_real
        assert K % 2 == 1, "only odd kernel sizes ('same' padding) supported"
        P = pool if pool > 0 else 1                       # pool == 0 -> no pooling
        # TODO(synk): MaxPool1d floor-mode remainder (L % pool != 0) not supported.
        assert L % P == 0, "pooled length must divide exactly"
        L_out = L // P
        cout_pad = _round_up(cout, 128)
        wt = jnp.transpose(w, (2, 1, 0))                  # (K, Cin, Cout)
        wt = jnp.pad(wt, ((0, 0), (0, cin_pad - cin_l), (0, cout_pad - cout)))
        bt = jnp.pad(b, (0, cout_pad - cout)).reshape(1, cout_pad)
        prep["conv_w"].append(wt.astype(jnp.bfloat16))
        prep["conv_b"].append(bt.astype(jnp.float32))
        prep["meta"].append(LayerMeta(K=K, pad=K // 2, P=P, L_in=L, L_out=L_out,
                                      Cin_p=cin_pad, Cout_p=cout_pad, seg=L + 2 * (K // 2)))
        cin_real, cin_pad, L = cout, cout_pad, L_out

    O, D = params["fc_w"].shape
    assert D == cin_real * L, "fc sizing must match conv output (see module spec)"
    O_pad = _round_up(O, 128)
    wf = params["fc_w"].reshape(O, cin_real, L)           # torch flatten order: (O, C, L)
    wf = jnp.transpose(wf, (2, 1, 0))                     # (L, C, O) time-major, channels-last
    wf = jnp.pad(wf, ((0, 0), (0, cin_pad - cin_real), (0, O_pad - O)))   # zero rows / cols
    prep["fc_w"] = wf.reshape(L * cin_pad, O_pad).astype(jnp.bfloat16)
    prep["fc_b"] = jnp.pad(params["fc_b"], (0, O_pad - O)).reshape(1, O_pad).astype(jnp.float32)
    prep["out_dim"] = O
    prep["out_pad"] = O_pad
    return prep


def tcn_forward(x, prep):
    """x: (B, num_timestamps, input_dim) — identical to the PyTorch module's forward input."""
    B, T, Cin = x.shape
    meta = prep["meta"]
    O, O_pad = prep["out_dim"], prep["out_pad"]
    nl = len(meta)
    assert meta[0].L_in == T and meta[0].Cin_p == Cin
    Lo, Cl = meta[-1].L_out, meta[-1].Cout_p

    def kernel(*args):
        x_ref = args[0]
        conv_w = [args[1 + 2 * i] for i in range(nl)]
        conv_b = [args[2 + 2 * i] for i in range(nl)]
        wf_ref = args[1 + 2 * nl]
        bf_ref = args[2 + 2 * nl]
        o_ref = args[3 + 2 * nl]
        xp_refs = args[4 + 2 * nl: 4 + 3 * nl]            # bf16 zero-halo padded inputs
        act_refs = args[4 + 3 * nl: 4 + 4 * nl]           # f32 full-length conv activations
        feat_ref = args[4 + 4 * nl]                       # f32 lane-dense (B, Lo*Cl) FC slab

        # Zero the padded-input scratches once: halo rows stay zero, interiors are rewritten.
        for xp in xp_refs:
            xp[...] = jnp.zeros_like(xp)

        # Stage the raw input for the whole batch (single f32 -> bf16 cast point).
        m0 = meta[0]
        for b in range(B):
            xp_refs[0][pl.ds(b * m0.seg + m0.pad, m0.L_in), :] = x_ref[b].astype(jnp.bfloat16)

        for li, m in enumerate(meta):
            xp, act = xp_refs[li], act_refs[li]
            M = B * m.seg                                 # batch-stacked conv output rows
            # Conv1d: one batch-stacked dot per tap (contiguous bf16 reads, f32 MXU accumulate).
            # Rows that correspond to halo positions are computed but never read.
            acc = None
            for k in range(m.K):
                d = jnp.dot(xp[pl.ds(k, M), :], conv_w[li][k],
                            preferred_element_type=jnp.float32)
                acc = d if acc is None else acc + d
            # Bias + ReLU in f32 (VPU), stored full-length once.
            act[...] = jnp.maximum(acc + conv_b[li][...], 0.0)

            # MaxPool (P strided reads per batch + register max), fused with staging of the next
            # layer's bf16 input / the lane-dense FC feature slab.
            last = li == nl - 1
            for b in range(B):
                pooled = None
                for p in range(m.P):
                    v = (act[pl.ds(b * m.seg + p, m.L_out, stride=m.P), :] if m.P > 1
                         else act[pl.ds(b * m.seg, m.L_out), :])
                    pooled = v if pooled is None else jnp.maximum(pooled, v)
                if not last:
                    nxt = meta[li + 1]
                    xp_refs[li + 1][pl.ds(b * nxt.seg + nxt.pad, m.L_out), :] = (
                        pooled.astype(jnp.bfloat16))
                else:
                    for l in range(m.L_out):
                        feat_ref[pl.ds(b, 1), pl.ds(l * m.Cout_p, m.Cout_p)] = pooled[l:l + 1, :]

        # Fully connected: ONE MXU matmul, contraction depth Lo*Cl; fc_w was permuted / padded
        # offline so no runtime transpose, gather, or masked output store is needed.
        out = jnp.dot(feat_ref[...].astype(jnp.bfloat16), wf_ref[...],
                      preferred_element_type=jnp.float32)
        o_ref[...] = (out + bf_ref[...]).astype(o_ref.dtype)

    operands = [x.astype(jnp.float32)]
    for w, b in zip(prep["conv_w"], prep["conv_b"]):
        operands += [w, b]
    operands += [prep["fc_w"], prep["fc_b"]]

    vmem = pl.BlockSpec(memory_space=pltpu.MemorySpace.VMEM)
    out_full = pl.pallas_call(
        kernel,
        out_shape=jax.ShapeDtypeStruct((B, O_pad), jnp.float32),
        in_specs=[vmem] * len(operands),
        out_specs=vmem,
        scratch_shapes=(
            [pltpu.VMEM((B * m.seg + 2 * m.pad, m.Cin_p), jnp.bfloat16) for m in meta]
            + [pltpu.VMEM((B * m.seg, m.Cout_p), jnp.float32) for m in meta]
            + [pltpu.VMEM((B, Lo * Cl), jnp.float32)]
        ),
    )(*operands)
    return out_full[:, :O]


def init_params(key, input_dim, num_timestamps, conv_layers, output_dim):
    """Deterministic synthetic weights in PyTorch layouts (uniform(+/-1/sqrt(fan_in)))."""
    params = {"conv": []}
    in_ch, out_len = input_dim, num_timestamps
    for filters, ksize, pool in conv_layers:
        key, kw, kb = jax.random.split(key, 3)
        bound = 1.0 / math.sqrt(in_ch * ksize)
        w = jax.random.uniform(kw, (filters, in_ch, ksize), jnp.float32, -bound, bound)
        b = jax.random.uniform(kb, (filters,), jnp.float32, -bound, bound)
        params["conv"].append((w, b, pool))
        in_ch = filters
        if pool > 0:
            out_len = (out_len + pool - 1) // pool
    key, kw, kb = jax.random.split(key, 3)
    D = in_ch * out_len
    bound = 1.0 / math.sqrt(D)
    params["fc_w"] = jax.random.uniform(kw, (output_dim, D), jnp.float32, -bound, bound)
    params["fc_b"] = jax.random.uniform(kb, (output_dim,), jnp.float32, -bound, bound)
    return params


def ref_forward(x, params):
    """Pure-JAX f32 reference mirroring the PyTorch forward (for a sanity check)."""
    h = jnp.transpose(x.astype(jnp.float32), (0, 2, 1))             # (B, C, L)
    for w, b, pool in params["conv"]:
        K = w.shape[2]
        h = jax.lax.conv_general_dilated(
            h, w, window_strides=(1,), padding=[(K // 2, K // 2)],
            dimension_numbers=("NCH", "OIH", "NCH"))
        h = jnp.maximum(h + b[None, :, None], 0.0)
        if pool > 0:
            h = jax.lax.reduce_window(h, -jnp.inf, jax.lax.max,
                                      (1, 1, pool), (1, 1, pool), "VALID")
    flat = h.reshape(h.shape[0], -1)
    return flat @ params["fc_w"].T + params["fc_b"]


if __name__ == "__main__":
    B, T, IN_DIM, OUT_DIM = 2, 16, 4, 10
    conv_layers = [(64, 3, 2), (128, 3, 2)]                         # module defaults

    key = jax.random.PRNGKey(0)
    key, kx = jax.random.split(key)
    x = jax.random.normal(kx, (B, T, IN_DIM), jnp.float32)
    params = init_params(key, IN_DIM, T, conv_layers, OUT_DIM)
    prep = prepare_params(params, IN_DIM, T)

    out = tcn_forward(x, prep)
    out = jax.block_until_ready(out)

    ref = ref_forward(x, params)
    assert out.shape == (B, OUT_DIM), out.shape
    err = float(jnp.max(jnp.abs(out - ref)))
    # bf16 MXU operands (f32 accumulation) vs the all-f32 reference; outputs are O(0.1),
    # a real indexing/permutation bug would show up as O(0.1+) error.
    assert err < 3e-2, f"max abs err vs reference: {err}"
    print("KERNEL_OK")
</pallas_src>

<mosaic_0001>
module attributes {stable_mosaic.version = 11 : i64} {
  func.func @kernel(%arg0: memref<2x16x4xf32, #tpu.memory_space<vmem>>, %arg1: memref<3x4x128xbf16, #tpu.memory_space<vmem>>, %arg2: memref<1x128xf32, #tpu.memory_space<vmem>>, %arg3: memref<3x128x128xbf16, #tpu.memory_space<vmem>>, %arg4: memref<1x128xf32, #tpu.memory_space<vmem>>, %arg5: memref<512x128xbf16, #tpu.memory_space<vmem>>, %arg6: memref<1x128xf32, #tpu.memory_space<vmem>>, %arg7: memref<2x128xf32, #tpu.memory_space<vmem>>, %arg8: memref<38x4xbf16, #tpu.memory_space<vmem>>, %arg9: memref<22x128xbf16, #tpu.memory_space<vmem>>, %arg10: memref<36x128xf32, #tpu.memory_space<vmem>>, %arg11: memref<20x128xf32, #tpu.memory_space<vmem>>, %arg12: memref<2x512xf32, #tpu.memory_space<vmem>>) attributes {dimension_semantics = [], scalar_prefetch = 0 : i64, scratch_operands = 5 : i64, tpu.core_type = #tpu.core_type<tc>} {
    %cst = arith.constant 0.000000e+00 : bf16
    %0 = vector.broadcast %cst : bf16 to vector<38x4xbf16>
    %c0 = arith.constant 0 : index
    %c0_0 = arith.constant 0 : index
    %1 = vector.load %arg8[%c0, %c0_0] : memref<38x4xbf16, #tpu.memory_space<vmem>>, vector<38x4xbf16>
    tpu.vector_store %arg8[%c0, %c0_0], %0 {strides = array<i32>} : memref<38x4xbf16, #tpu.memory_space<vmem>>, vector<38x4xbf16>,
    %cst_1 = arith.constant 0.000000e+00 : bf16
    %2 = vector.broadcast %cst_1 : bf16 to vector<22x128xbf16>
    %c0_2 = arith.constant 0 : index
    %c0_3 = arith.constant 0 : index
    %3 = vector.load %arg9[%c0_2, %c0_3] : memref<22x128xbf16, #tpu.memory_space<vmem>>, vector<22x128xbf16>
    tpu.vector_store %arg9[%c0_2, %c0_3], %2 {strides = array<i32>} : memref<22x128xbf16, #tpu.memory_space<vmem>>, vector<22x128xbf16>,
    %c0_4 = arith.constant 0 : index
    %c0_5 = arith.constant 0 : index
    %c0_6 = arith.constant 0 : index
    %4 = vector.load %arg0[%c0_4, %c0_5, %c0_6] : memref<2x16x4xf32, #tpu.memory_space<vmem>>, vector<1x16x4xf32>
    %5 = vector.shape_cast %4 : vector<1x16x4xf32> to vector<16x4xf32>
    %6 = arith.truncf %5 : vector<16x4xf32> to vector<16x4xbf16>
    %c1 = arith.constant 1 : index
    %c0_7 = arith.constant 0 : index
    %7 = vector.load %arg8[%c1, %c0_7] : memref<38x4xbf16, #tpu.memory_space<vmem>>, vector<16x4xbf16>
    tpu.vector_store %arg8[%c1, %c0_7], %6 {strides = array<i32>} : memref<38x4xbf16, #tpu.memory_space<vmem>>, vector<16x4xbf16>,
    %c1_8 = arith.constant 1 : index
    %c0_9 = arith.constant 0 : index
    %c0_10 = arith.constant 0 : index
    %8 = vector.load %arg0[%c1_8, %c0_9, %c0_10] : memref<2x16x4xf32, #tpu.memory_space<vmem>>, vector<1x16x4xf32>
    %9 = vector.shape_cast %8 : vector<1x16x4xf32> to vector<16x4xf32>
    %10 = arith.truncf %9 : vector<16x4xf32> to vector<16x4xbf16>
    %c19 = arith.constant 19 : index
    %c0_11 = arith.constant 0 : index
    %11 = vector.load %arg8[%c19, %c0_11] : memref<38x4xbf16, #tpu.memory_space<vmem>>, vector<16x4xbf16>
    tpu.vector_store %arg8[%c19, %c0_11], %10 {strides = array<i32>} : memref<38x4xbf16, #tpu.memory_space<vmem>>, vector<16x4xbf16>,
    %c0_12 = arith.constant 0 : index
    %c0_13 = arith.constant 0 : index
    %12 = vector.load %arg8[%c0_12, %c0_13] : memref<38x4xbf16, #tpu.memory_space<vmem>>, vector<36x4xbf16>
    %c0_14 = arith.constant 0 : index
    %c0_15 = arith.constant 0 : index
    %c0_16 = arith.constant 0 : index
    %13 = vector.load %arg1[%c0_14, %c0_15, %c0_16] : memref<3x4x128xbf16, #tpu.memory_space<vmem>>, vector<1x4x128xbf16>
    %14 = vector.shape_cast %13 : vector<1x4x128xbf16> to vector<4x128xbf16>
    %cst_17 = arith.constant dense<0.000000e+00> : vector<36x128xf32>
    %15 = tpu.matmul %12, %14, %cst_17 {dimension_numbers = #tpu.dot_dimension_numbers<[1], [0], [0], [1], [0, 0, 1, 1], [], []>} : vector<36x4xbf16>, vector<4x128xbf16>, vector<36x128xf32> -> vector<36x128xf32>
    %c1_18 = arith.constant 1 : index
    %c0_19 = arith.constant 0 : index
    %16 = vector.load %arg8[%c1_18, %c0_19] : memref<38x4xbf16, #tpu.memory_space<vmem>>, vector<36x4xbf16>
    %c1_20 = arith.constant 1 : index
    %c0_21 = arith.constant 0 : index
    %c0_22 = arith.constant 0 : index
    %17 = vector.load %arg1[%c1_20, %c0_21, %c0_22] : memref<3x4x128xbf16, #tpu.memory_space<vmem>>, vector<1x4x128xbf16>
    %18 = vector.shape_cast %17 : vector<1x4x128xbf16> to vector<4x128xbf16>
    %cst_23 = arith.constant dense<0.000000e+00> : vector<36x128xf32>
    %19 = tpu.matmul %16, %18, %cst_23 {dimension_numbers = #tpu.dot_dimension_numbers<[1], [0], [0], [1], [0, 0, 1, 1], [], []>} : vector<36x4xbf16>, vector<4x128xbf16>, vector<36x128xf32> -> vector<36x128xf32>
    %20 = arith.addf %15, %19 : vector<36x128xf32>
    %c2 = arith.constant 2 : index
    %c0_24 = arith.constant 0 : index
    %21 = vector.load %arg8[%c2, %c0_24] : memref<38x4xbf16, #tpu.memory_space<vmem>>, vector<36x4xbf16>
    %c2_25 = arith.constant 2 : index
    %c0_26 = arith.constant 0 : index
    %c0_27 = arith.constant 0 : index
    %22 = vector.load %arg1[%c2_25, %c0_26, %c0_27] : memref<3x4x128xbf16, #tpu.memory_space<vmem>>, vector<1x4x128xbf16>
    %23 = vector.shape_cast %22 : vector<1x4x128xbf16> to vector<4x128xbf16>
    %cst_28 = arith.constant dense<0.000000e+00> : vector<36x128xf32>
    %24 = tpu.matmul %21, %23, %cst_28 {dimension_numbers = #tpu.dot_dimension_numbers<[1], [0], [0], [1], [0, 0, 1, 1], [], []>} : vector<36x4xbf16>, vector<4x128xbf16>, vector<36x128xf32> -> vector<36x128xf32>
    %25 = arith.addf %20, %24 : vector<36x128xf32>
    %c0_29 = arith.constant 0 : index
    %c0_30 = arith.constant 0 : index
    %26 = vector.load %arg2[%c0_29, %c0_30] : memref<1x128xf32, #tpu.memory_space<vmem>>, vector<1x128xf32>
    %27 = vector.broadcast %26 : vector<1x128xf32> to vector<36x128xf32>
    %28 = arith.addf %25, %27 : vector<36x128xf32>
    %cst_31 = arith.constant 0.000000e+00 : f32
    %29 = vector.broadcast %cst_31 : f32 to vector<36x128xf32>
    %30 = arith.maximumf %28, %29 : vector<36x128xf32>
    %c0_32 = arith.constant 0 : index
    %c0_33 = arith.constant 0 : index
    %31 = vector.load %arg10[%c0_32, %c0_33] : memref<36x128xf32, #tpu.memory_space<vmem>>, vector<36x128xf32>
    tpu.vector_store %arg10[%c0_32, %c0_33], %30 {strides = array<i32>} : memref<36x128xf32, #tpu.memory_space<vmem>>, vector<36x128xf32>,
    %c0_34 = arith.constant 0 : index
    %c0_35 = arith.constant 0 : index
    %32 = tpu.strided_load %arg10[%c0_34, %c0_35] {strides = array<i32: 2, 1>} : memref<36x128xf32, #tpu.memory_space<vmem>>, vector<8x128xf32>
    %c1_36 = arith.constant 1 : index
    %c0_37 = arith.constant 0 : index
    %33 = tpu.strided_load %arg10[%c1_36, %c0_37] {strides = array<i32: 2, 1>} : memref<36x128xf32, #tpu.memory_space<vmem>>, vector<8x128xf32>
    %34 = arith.maximumf %32, %33 : vector<8x128xf32>
    %35 = arith.truncf %34 : vector<8x128xf32> to vector<8x128xbf16>
    %c1_38 = arith.constant 1 : index
    %c0_39 = arith.constant 0 : index
    %36 = vector.load %arg9[%c1_38, %c0_39] : memref<22x128xbf16, #tpu.memory_space<vmem>>, vector<8x128xbf16>
    tpu.vector_store %arg9[%c1_38, %c0_39], %35 {strides = array<i32>} : memref<22x128xbf16, #tpu.memory_space<vmem>>, vector<8x128xbf16>,
    %c18 = arith.constant 18 : index
    %c0_40 = arith.constant 0 : index
    %37 = tpu.strided_load %arg10[%c18, %c0_40] {strides = array<i32: 2, 1>} : memref<36x128xf32, #tpu.memory_space<vmem>>, vector<8x128xf32>
    %c19_41 = arith.constant 19 : index
    %c0_42 = arith.constant 0 : index
    %38 = tpu.strided_load %arg10[%c19_41, %c0_42] {strides = array<i32: 2, 1>} : memref<36x128xf32, #tpu.memory_space<vmem>>, vector<8x128xf32>
    %39 = arith.maximumf %37, %38 : vector<8x128xf32>
    %40 = arith.truncf %39 : vector<8x128xf32> to vector<8x128xbf16>
    %c11 = arith.constant 11 : index
    %c0_43 = arith.constant 0 : index
    %41 = vector.load %arg9[%c11, %c0_43] : memref<22x128xbf16, #tpu.memory_space<vmem>>, vector<8x128xbf16>
    tpu.vector_store %arg9[%c11, %c0_43], %40 {strides = array<i32>} : memref<22x128xbf16, #tpu.memory_space<vmem>>, vector<8x128xbf16>,
    %c0_44 = arith.constant 0 : index
    %c0_45 = arith.constant 0 : index
    %42 = vector.load %arg9[%c0_44, %c0_45] : memref<22x128xbf16, #tpu.memory_space<vmem>>, vector<20x128xbf16>
    %c0_46 = arith.constant 0 : index
    %c0_47 = arith.constant 0 : index
    %c0_48 = arith.constant 0 : index
    %43 = vector.load %arg3[%c0_46, %c0_47, %c0_48] : memref<3x128x128xbf16, #tpu.memory_space<vmem>>, vector<1x128x128xbf16>
    %44 = vector.shape_cast %43 : vector<1x128x128xbf16> to vector<128x128xbf16>
    %cst_49 = arith.constant dense<0.000000e+00> : vector<20x128xf32>
    %45 = tpu.matmul %42, %44, %cst_49 {dimension_numbers = #tpu.dot_dimension_numbers<[1], [0], [0], [1], [0, 0, 1, 1], [], []>} : vector<20x128xbf16>, vector<128x128xbf16>, vector<20x128xf32> -> vector<20x128xf32>
    %c1_50 = arith.constant 1 : index
    %c0_51 = arith.constant 0 : index
    %46 = vector.load %arg9[%c1_50, %c0_51] : memref<22x128xbf16, #tpu.memory_space<vmem>>, vector<20x128xbf16>
    %c1_52 = arith.constant 1 : index
    %c0_53 = arith.constant 0 : index
    %c0_54 = arith.constant 0 : index
    %47 = vector.load %arg3[%c1_52, %c0_53, %c0_54] : memref<3x128x128xbf16, #tpu.memory_space<vmem>>, vector<1x128x128xbf16>
    %48 = vector.shape_cast %47 : vector<1x128x128xbf16> to vector<128x128xbf16>
    %cst_55 = arith.constant dense<0.000000e+00> : vector<20x128xf32>
    %49 = tpu.matmul %46, %48, %cst_55 {dimension_numbers = #tpu.dot_dimension_numbers<[1], [0], [0], [1], [0, 0, 1, 1], [], []>} : vector<20x128xbf16>, vector<128x128xbf16>, vector<20x128xf32> -> vector<20x128xf32>
    %50 = arith.addf %45, %49 : vector<20x128xf32>
    %c2_56 = arith.constant 2 : index
    %c0_57 = arith.constant 0 : index
    %51 = vector.load %arg9[%c2_56, %c0_57] : memref<22x128xbf16, #tpu.memory_space<vmem>>, vector<20x128xbf16>
    %c2_58 = arith.constant 2 : index
    %c0_59 = arith.constant 0 : index
    %c0_60 = arith.constant 0 : index
    %52 = vector.load %arg3[%c2_58, %c0_59, %c0_60] : memref<3x128x128xbf16, #tpu.memory_space<vmem>>, vector<1x128x128xbf16>
    %53 = vector.shape_cast %52 : vector<1x128x128xbf16> to vector<128x128xbf16>
    %cst_61 = arith.constant dense<0.000000e+00> : vector<20x128xf32>
    %54 = tpu.matmul %51, %53, %cst_61 {dimension_numbers = #tpu.dot_dimension_numbers<[1], [0], [0], [1], [0, 0, 1, 1], [], []>} : vector<20x128xbf16>, vector<128x128xbf16>, vector<20x128xf32> -> vector<20x128xf32>
    %55 = arith.addf %50, %54 : vector<20x128xf32>
    %c0_62 = arith.constant 0 : index
    %c0_63 = arith.constant 0 : index
    %56 = vector.load %arg4[%c0_62, %c0_63] : memref<1x128xf32, #tpu.memory_space<vmem>>, vector<1x128xf32>
    %57 = vector.broadcast %56 : vector<1x128xf32> to vector<20x128xf32>
    %58 = arith.addf %55, %57 : vector<20x128xf32>
    %cst_64 = arith.constant 0.000000e+00 : f32
    %59 = vector.broadcast %cst_64 : f32 to vector<20x128xf32>
    %60 = arith.maximumf %58, %59 : vector<20x128xf32>
    %c0_65 = arith.constant 0 : index
    %c0_66 = arith.constant 0 : index
    %61 = vector.load %arg11[%c0_65, %c0_66] : memref<20x128xf32, #tpu.memory_space<vmem>>, vector<20x128xf32>
    tpu.vector_store %arg11[%c0_65, %c0_66], %60 {strides = array<i32>} : memref<20x128xf32, #tpu.memory_space<vmem>>, vector<20x128xf32>,
    %c0_67 = arith.constant 0 : index
    %c0_68 = arith.constant 0 : index
    %62 = tpu.strided_load %arg11[%c0_67, %c0_68] {strides = array<i32: 2, 1>} : memref<20x128xf32, #tpu.memory_space<vmem>>, vector<4x128xf32>
    %c1_69 = arith.constant 1 : index
    %c0_70 = arith.constant 0 : index
    %63 = tpu.strided_load %arg11[%c1_69, %c0_70] {strides = array<i32: 2, 1>} : memref<20x128xf32, #tpu.memory_space<vmem>>, vector<4x128xf32>
    %64 = arith.maximumf %62, %63 : vector<4x128xf32>
    %65 = vector.extract_strided_slice %64 {offsets = [0, 0], sizes = [1, 128], strides = [1, 1]} : vector<4x128xf32> to vector<1x128xf32>
    %c0_71 = arith.constant 0 : index
    %c0_72 = arith.constant 0 : index
    %66 = vector.load %arg12[%c0_71, %c0_72] : memref<2x512xf32, #tpu.memory_space<vmem>>, vector<1x128xf32>
    tpu.vector_store %arg12[%c0_71, %c0_72], %65 {strides = array<i32>} : memref<2x512xf32, #tpu.memory_space<vmem>>, vector<1x128xf32>,
    %67 = vector.extract_strided_slice %64 {offsets = [1, 0], sizes = [1, 128], strides = [1, 1]} : vector<4x128xf32> to vector<1x128xf32>
    %c0_73 = arith.constant 0 : index
    %c128 = arith.constant 128 : index
    %68 = vector.load %arg12[%c0_73, %c128] : memref<2x512xf32, #tpu.memory_space<vmem>>, vector<1x128xf32>
    tpu.vector_store %arg12[%c0_73, %c128], %67 {strides = array<i32>} : memref<2x512xf32, #tpu.memory_space<vmem>>, vector<1x128xf32>,
    %69 = vector.extract_strided_slice %64 {offsets = [2, 0], sizes = [1, 128], strides = [1, 1]} : vector<4x128xf32> to vector<1x128xf32>
    %c0_74 = arith.constant 0 : index
    %c256 = arith.constant 256 : index
    %70 = vector.load %arg12[%c0_74, %c256] : memref<2x512xf32, #tpu.memory_space<vmem>>, vector<1x128xf32>
    tpu.vector_store %arg12[%c0_74, %c256], %69 {strides = array<i32>} : memref<2x512xf32, #tpu.memory_space<vmem>>, vector<1x128xf32>,
    %71 = vector.extract_strided_slice %64 {offsets = [3, 0], sizes = [1, 128], strides = [1, 1]} : vector<4x128xf32> to vector<1x128xf32>
    %c0_75 = arith.constant 0 : index
    %c384 = arith.constant 384 : index
    %72 = vector.load %arg12[%c0_75, %c384] : memref<2x512xf32, #tpu.memory_space<vmem>>, vector<1x128xf32>
    tpu.vector_store %arg12[%c0_75, %c384], %71 {strides = array<i32>} : memref<2x512xf32, #tpu.memory_space<vmem>>, vector<1x128xf32>,
    %c10 = arith.constant 10 : index
    %c0_76 = arith.constant 0 : index
    %73 = tpu.strided_load %arg11[%c10, %c0_76] {strides = array<i32: 2, 1>} : memref<20x128xf32, #tpu.memory_space<vmem>>, vector<4x128xf32>
    %c11_77 = arith.constant 11 : index
    %c0_78 = arith.constant 0 : index
    %74 = tpu.strided_load %arg11[%c11_77, %c0_78] {strides = array<i32: 2, 1>} : memref<20x128xf32, #tpu.memory_space<vmem>>, vector<4x128xf32>
    %75 = arith.maximumf %73, %74 : vector<4x128xf32>
    %76 = vector.extract_strided_slice %75 {offsets = [0, 0], sizes = [1, 128], strides = [1, 1]} : vector<4x128xf32> to vector<1x128xf32>
    %c1_79 = arith.constant 1 : index
    %c0_80 = arith.constant 0 : index
    %77 = vector.load %arg12[%c1_79, %c0_80] : memref<2x512xf32, #tpu.memory_space<vmem>>, vector<1x128xf32>
    tpu.vector_store %arg12[%c1_79, %c0_80], %76 {strides = array<i32>} : memref<2x512xf32, #tpu.memory_space<vmem>>, vector<1x128xf32>,
    %78 = vector.extract_strided_slice %75 {offsets = [1, 0], sizes = [1, 128], strides = [1, 1]} : vector<4x128xf32> to vector<1x128xf32>
    %c1_81 = arith.constant 1 : index
    %c128_82 = arith.constant 128 : index
    %79 = vector.load %arg12[%c1_81, %c128_82] : memref<2x512xf32, #tpu.memory_space<vmem>>, vector<1x128xf32>
    tpu.vector_store %arg12[%c1_81, %c128_82], %78 {strides = array<i32>} : memref<2x512xf32, #tpu.memory_space<vmem>>, vector<1x128xf32>,
    %80 = vector.extract_strided_slice %75 {offsets = [2, 0], sizes = [1, 128], strides = [1, 1]} : vector<4x128xf32> to vector<1x128xf32>
    %c1_83 = arith.constant 1 : index
    %c256_84 = arith.constant 256 : index
    %81 = vector.load %arg12[%c1_83, %c256_84] : memref<2x512xf32, #tpu.memory_space<vmem>>, vector<1x128xf32>
    tpu.vector_store %arg12[%c1_83, %c256_84], %80 {strides = array<i32>} : memref<2x512xf32, #tpu.memory_space<vmem>>, vector<1x128xf32>,
    %82 = vector.extract_strided_slice %75 {offsets = [3, 0], sizes = [1, 128], strides = [1, 1]} : vector<4x128xf32> to vector<1x128xf32>
    %c1_85 = arith.constant 1 : index
    %c384_86 = arith.constant 384 : index
    %83 = vector.load %arg12[%c1_85, %c384_86] : memref<2x512xf32, #tpu.memory_space<vmem>>, vector<1x128xf32>
    tpu.vector_store %arg12[%c1_85, %c384_86], %82 {strides = array<i32>} : memref<2x512xf32, #tpu.memory_space<vmem>>, vector<1x128xf32>,
    %c0_87 = arith.constant 0 : index
    %c0_88 = arith.constant 0 : index
    %84 = vector.load %arg12[%c0_87, %c0_88] : memref<2x512xf32, #tpu.memory_space<vmem>>, vector<2x512xf32>
    %85 = arith.truncf %84 : vector<2x512xf32> to vector<2x512xbf16>
    %c0_89 = arith.constant 0 : index
    %c0_90 = arith.constant 0 : index
    %86 = vector.load %arg5[%c0_89, %c0_90] : memref<512x128xbf16, #tpu.memory_space<vmem>>, vector<512x128xbf16>
    %cst_91 = arith.constant dense<0.000000e+00> : vector<2x128xf32>
    %87 = tpu.matmul %85, %86, %cst_91 {dimension_numbers = #tpu.dot_dimension_numbers<[1], [0], [0], [1], [0, 0, 1, 1], [], []>} : vector<2x512xbf16>, vector<512x128xbf16>, vector<2x128xf32> -> vector<2x128xf32>
    %c0_92 = arith.constant 0 : index
    %c0_93 = arith.constant 0 : index
    %88 = vector.load %arg6[%c0_92, %c0_93] : memref<1x128xf32, #tpu.memory_space<vmem>>, vector<1x128xf32>
    %89 = vector.broadcast %88 : vector<1x128xf32> to vector<2x128xf32>
    %90 = arith.addf %87, %89 : vector<2x128xf32>
    %c0_94 = arith.constant 0 : index
    %c0_95 = arith.constant 0 : index
    %91 = vector.load %arg7[%c0_94, %c0_95] : memref<2x128xf32, #tpu.memory_space<vmem>>, vector<2x128xf32>
    tpu.vector_store %arg7[%c0_94, %c0_95], %90 {strides = array<i32>} : memref<2x128xf32, #tpu.memory_space<vmem>>, vector<2x128xf32>,
    return
  }
}

</mosaic_0001>

<bundles_post_ra>
// kernel: tpu_custom_call.1
= control target key start
LH: loop header
LB: loop body
LE: loop exit
PB: predicated region body
PF: predicated region fallthrough
CT: control target
= control target key end

     0   :  { %12 = vsyncpa [#allocation8], 0  ;;  %s1995_s0 = inlined_call_operand.vmem [shape: f32[2,16,4], index: 0, kind: input, shape index: {}]   ;;  %s1996_s1 = inlined_call_operand.vmem [shape: bf16[3,4,128], index: 1, kind: input, shape index: {}]   ;;  %s1997_s2 = inlined_call_operand.vmem [shape: f32[1,128], index: 2, kind: input, shape index: {}]   ;;  %s1998_s3 = inlined_call_operand.hbm [shape: bf16[3,128,128], index: 3, kind: input, shape index: {}]   ;;  %s1999_s4 = inlined_call_operand.vmem [shape: f32[1,128], index: 4, kind: input, shape index: {}]   ;;  %s2000_s5 = inlined_call_operand.hbm [shape: bf16[512,128], index: 5, kind: input, shape index: {}]   ;;  %s2001_s6 = inlined_call_operand.vmem [shape: f32[1,128], index: 6, kind: input, shape index: {}]   ;;  %s2002_s7 = inlined_call_operand.hbm [shape: f32[2,128], index: 7, kind: output, shape index: {}]  }
   0x1   :  { %13 = vsyncpa [#allocation11], 0 }
   0x2   :  { %14 = vsyncpa [#allocation9], 0  ;;  %s1773_s24 = smov [#allocation7]   ;;  %s1701_s28 = scalar_lea.hbm %s1998_s3, 3072 }
   0x3   :  { %s26_s25 = sshll.u32 %s1773_s24, 4  ;;  %p1702_p0 = scmp.ne.s32.totalorder %s1998_s3, %s1701_s28  ;;  %s27_s25 = int_to_ptr.vmem [resolvable:$true] %s26_s25 }
   0x4   :  { %p1705_p1 = scmp.lt.u32.totalorder %s1701_s28, %s1998_s3 }
   0x6   :  { %p1707_p2 = pnand %p1705_p1, %p1702_p0 }
   0x8   :  { %1710 = shalt.err (!%p1707_p2)
}
   0x9   :  { %s1711_s10 = scalar_lea.vmem %s27_s25, 3072  ;;  %p1716_p4 = scmp.lt.s32.totalorder %s27_s25, %s27_s25 }
   0xa   :  { %p1712_p3 = scmp.ne.s32.totalorder %s27_s25, %s1711_s10  ;;  %p1717_p5 = scmp.lt.s32.totalorder %s1711_s10, %s1711_s10 }
   0xc   :  { %p1718_p6 = por %p1717_p5, %p1716_p4 }
   0xe   :  { %p1719_p7 = pnand %p1718_p6, %p1712_p3 }
  0x10   :  { %1722 = shalt.err (!%p1719_p7)
}
  0x11   :  { %s1774_s11 = smov 64   ;;  %s1775_s12 = smov 4  }
  0x12   :  { %32 = dma.hbm_to_vmem [thread:$0]  %s1998_s3, 3072, %s27_s25, [#allocation8], %s1774_s11, %s1774_s11, %s1775_s12  }
  0x13   :  { %s1776_s15 = smov [#allocation10]   ;;  %s1723_s19 = scalar_lea.hbm %s2000_s5, 4096 }
  0x14   :  { %s40_s16 = sshll.u32 %s1776_s15, 4  ;;  %p1724_p8 = scmp.ne.s32.totalorder %s2000_s5, %s1723_s19  ;;  %s41_s16 = int_to_ptr.vmem [resolvable:$true] %s40_s16 }
  0x15   :  { %p1727_p9 = scmp.lt.u32.totalorder %s1723_s19, %s2000_s5 }
  0x17   :  { %p1729_p10 = pnand %p1727_p9, %p1724_p8 }
  0x19   :  { %1732 = shalt.err (!%p1729_p10)
}
  0x1a   :  { %s1733_s24 = scalar_lea.vmem %s41_s16, 4096  ;;  %p1738_p12 = scmp.lt.s32.totalorder %s41_s16, %s41_s16 }
  0x1b   :  { %p1734_p11 = scmp.ne.s32.totalorder %s41_s16, %s1733_s24  ;;  %p1739_p13 = scmp.lt.s32.totalorder %s1733_s24, %s1733_s24 }
  0x1d   :  { %p1740_p0 = por %p1739_p13, %p1738_p12 }
  0x1f   :  { %p1741_p1 = pnand %p1740_p0, %p1734_p11 }
  0x21   :  { %1744 = shalt.err (!%p1741_p1)
}
  0x22   :  { %46 = dma.hbm_to_vmem [thread:$0]  %s2000_s5, 4096, %s41_s16, [#allocation11], %s1774_s11, %s1774_s11, %s1775_s12  }
  0x23   :  { %1767 = dma.done.wait [#allocation8], 3072  }
  0x24   :  { %1768 = vsyncadd [#allocation8], 4294964224 }
  0x25   :  { %1769 = dma.done.wait [#allocation11], 4096  }
  0x26   :  { %1770 = vsyncadd [#allocation11], 4294963200  ;;  %vm56_vm0 = vcmask 27648   ;;  %vm61_vm1 = vcmask 26624   ;;  %v1777_v0 = vmov 0.0   ;;  %v1778_v1 = vmov 0  }
  0x27   :  { %1524 = vmatprep.subr.bf16.mxu0 %v1777_v0  ;;  %57 = vst.msk [vmem:[#allocation2] sm:$0xf] %vm56_vm0, %v1778_v1  ;;  %58 = vst.msk [vmem:[#allocation2 + $0x4] sm:$0xf] %vm56_vm0, %v1778_v1  ;;  %1538 = vmatprep.subr.bf16.mxu1 %v1777_v0  ;;  %vm74_vm2 = vsmask.f32 256 }
  0x28   :  { %59 = vst.msk [vmem:[#allocation2 + $0x8] sm:$0xf] %vm56_vm0, %v1778_v1  ;;  %60 = vst.msk [vmem:[#allocation2 + $0xc] sm:$0xf] %vm56_vm0, %v1778_v1  ;;  %vm75_vm3 = vsmask.f32 4368 }
  0x29   :  { %62 = vst.msk [vmem:[#allocation2 + $0x10] sm:$0x7] %vm61_vm1, %v1778_v1  ;;  %63 = vst [vmem:[#allocation3] sm:$0xf] %v1778_v1  ;;  %vm1779_vm4 = vmmov 0   ;;  %v66_v2 = vld [vmem:[%s1995_s0] sm:$0xff] }
  0x2a   :  { %64 = vst [vmem:[#allocation3 + $0x4] sm:$0xf] %v1778_v1  ;;  %65 = vst [vmem:[#allocation3 + $0x8] sm:$0x7] %v1778_v1  ;;  %1526 = vmatprep.mubr.msk.bf16.mxu0 %vm1779_vm4, %v1777_v0  ;;  %1540 = vmatprep.mubr.msk.bf16.mxu1 %vm1779_vm4, %v1777_v0  ;;  %vm98_vm5 = vsmask.f32 7938  ;;  %v1432_v5 = vpack.c.bf16 %v66_v2, %v66_v2 }
  0x2b   :  { %vm118_vm6 = vsmask.f32 1280  ;;  %v67_v3 = vld [vmem:[%s1995_s0 + $0x8] sm:$0xff]  ;;  %vm104_vm7 = vcmask 24576   ;;  %v1343_v4 = vld [vmem:[%s1995_s0 + $0x10] sm:$0xff]  ;;  %vm1866_vm9 = vmor %vm74_vm2, %vm75_vm3  ;;  %vm143_vm10 = vcmask 27649  }
  0x2c   :  { %vm119_vm8 = vsmask.f32 5392  ;;  %v1433_v6 = vpack.c.bf16 %v67_v3, %v67_v3  ;;  %v1344_v8 = vld [vmem:[%s1995_s0 + $0x18] sm:$0xff]  ;;  %v1434_v9 = vpack.c.bf16 %v1343_v4, %v1343_v4  ;;  %vm1875_vm11 = vmand %vm56_vm0, %vm98_vm5  ;;  %vm144_vm12 = vsmask.f32 7942  ;;  %v1649_v28 = vld [vmem:[#allocation7 + $0x28] sm:$0xff]  }
  0x2d   :  { %v1435_v11 = vpack.c.bf16 %v1344_v8, %v1344_v8  ;;  %vm150_vm13 = vcmask 25600   ;;  %vm211_vm14 = vcmask 1041408   ;;  %v78_v12 = vshrl.u32 %v1432_v5, 16  ;;  %vm1881_vm15 = vmand %vm104_vm7, %vm74_vm2  ;;  %v1347_v17 = vld [vmem:[%s1996_s1 + $0x2] sm:$0x3]  ;;  %s1781_s18 = smov [#allocation12]  }
  0x2e   :  { %v81_v13 = vshll.u32 %v1432_v5, 16  ;;  %v86_v14 = vshrl.u32 %v1433_v6, 16  ;;  %v89_v15 = vshll.u32 %v1433_v6, 16  ;;  %v100_v18 = vld [vmem:[#allocation2] sm:$0xf]  ;;  %v122_v20 = vshrl.u32 %v1434_v9, 16  ;;  %vm1890_vm1 = vmand %vm211_vm14, %vm118_vm6 }
  0x2f   :  { %v106_v19 = vld [vmem:[#allocation2 + $0x8] sm:$0x1]  ;;  %v125_v21 = vshll.u32 %v1434_v9, 16  ;;  %v131_v22 = vshrl.u32 %v1435_v11, 16  ;;  %v134_v23 = vshll.u32 %v1435_v11, 16  ;;  %v80_v26 = vrot.slane %v78_v12, 7  ;;  %vm1899_vm3 = vmor %vm118_vm6, %vm119_vm8 }
  0x30   :  { %v160_v25 = vld [vmem:[%s1996_s1] sm:$0x3]  ;;  %v88_v27 = vrot.slane %v86_v14, 7  ;;  %v146_v29 = vld [vmem:[#allocation2 + $0x8] sm:$0xe]  ;;  %v213_v30 = vsel %vm211_vm14, %v1347_v17, 0  ;;  %vm1907_vm7 = vmand %vm143_vm10, %vm144_vm12 }
  0x31   :  { %v282_v31 = vsel %vm211_vm14, %v160_v25, 0  ;;  %v124_v32 = vrot.slane %v122_v20, 6  ;;  %v127_v33 = vrot.slane %v125_v21, 7  ;;  %v133_v34 = vrot.slane %v131_v22, 6  ;;  %1525 = vmatpush3.bf16.msra.mxu0 %v213_v30  ;;  %vm1913_vm8 = vmand %vm150_vm13, %vm118_vm6  ;;  %v152_v44 = vld [vmem:[#allocation2 + $0x10] sm:$0x3] }
  0x32   :  { %v136_v35 = vrot.slane %v134_v23, 7  ;;  %1539 = vmatpush3.bf16.msra.mxu1 %v282_v31  ;;  %v83_v37 = vor.u32 %v81_v13, %v80_v26  ;;  %v84_v38 = vrot.slane %v80_v26, 4  ;;  %v91_v39 = vor.u32 %v89_v15, %v88_v27  ;;  %1552 = vmatprep.subr.bf16.mxu0 %v1777_v0  ;;  %v1358_v57 = vld [vmem:[%s1996_s1 + $0x4] sm:$0x3]  ;;  %v1641_v20 = vld [vmem:[#allocation7 + $0x8] sm:$0xff]   ;;  %v1642_v21 = vld [vmem:[#allocation7 + $0x40] sm:$0xff]  }
  0x33   :  { %v93_v40 = vrot.slane %v88_v27, 4  ;;  %v128_v42 = vor.u32 %v127_v33, %v124_v32  ;;  %vm201_vm10 = vcmask 31744   ;;  %v362_v2 = vsel %vm211_vm14, %v1358_v57, 0  ;;  %1566 = vmatprep.subr.bf16.mxu1 %v1642_v21  ;;  %v1643_v22 = vld [vmem:[#allocation7 + $0x10] sm:$0xff]   ;;  %v1644_v23 = vld [vmem:[#allocation7 + $0x48] sm:$0xff]   ;;  %v1645_v25 = vld [vmem:[#allocation7 + $0x18] sm:$0xff]  }
  0x34   :  { %v137_v43 = vor.u32 %v136_v35, %v133_v34  ;;  %v92_v45 = vsel %vm1866_vm9, %v84_v38, %v91_v39  ;;  %v101_v46 = vsel %vm1875_vm11, %v83_v37, %v100_v18  ;;  %vm346_vm6 = vcmask 1046528   ;;  %v1647_v26 = vld [vmem:[#allocation7 + $0x20] sm:$0xff]   ;;  %v1648_v27 = vld [vmem:[#allocation7 + $0x58] sm:$0xff]   ;;  %v1651_v30 = vld [vmem:[#allocation7 + $0x30] sm:$0xff]   ;;  %s1331_s19 = sshll.u32 %s1781_s18, 4  ;;  %s1332_s19 = int_to_ptr.vmem [resolvable:$true] %s1331_s19 }
  0x35   :  { %v107_v47 = vsel %vm1881_vm15, %v93_v40, %v106_v19  ;;  %103 = vst.msk [vmem:[#allocation2 + $0x4] sm:$0xf] %vm56_vm0, %v92_v45  ;;  %v129_v48 = vrot.slane %v128_v42, 4  ;;  %v147_v50 = vsel %vm1907_vm7, %v128_v42, %v146_v29  ;;  %102 = vst [vmem:[#allocation2] sm:$0xf] %v101_v46  ;;  %v1640_v19 = vld [vmem:[#allocation7] sm:$0xff]   ;;  %p1750_p3 = scmp.lt.s32.totalorder %s1332_s19, %s1332_s19 }
  0x36   :  { %108 = vst [vmem:[#allocation2 + $0x8] sm:$0x1] %v107_v47  ;;  %v139_v49 = vrot.slane %v137_v43, 4  ;;  %148 = vst [vmem:[#allocation2 + $0x8] sm:$0xe] %v147_v50  ;;  %v1650_v29 = vld [vmem:[#allocation7 + $0x60] sm:$0xff]  }
  0x37   :  { %v138_v51 = vsel %vm1899_vm3, %v129_v48, %v137_v43  ;;  %v1652_v31 = vld [vmem:[#allocation7 + $0x68] sm:$0xff]   ;;  %v1653_v32 = vld [vmem:[#allocation7 + $0x38] sm:$0xff]   ;;  %v1654_v33 = vld [vmem:[#allocation7 + $0x70] sm:$0xff]   ;;  %vm470_vm9 = vcmask 1040384   ;;  %vm495_vm14 = vcmask 1043457   ;;  %s1745_s20 = scalar_lea.vmem %s1332_s19, 32 }
  0x38   :  { %v153_v52 = vsel %vm1913_vm8, %v139_v49, %v152_v44  ;;  %149 = vst.msk [vmem:[#allocation2 + $0xc] sm:$0xf] %vm56_vm0, %v138_v51  ;;  %vm177_vm0 = vsmask.f32 7424  ;;  %v1658_v34 = vld [vmem:[#allocation7 + $0x78] sm:$0xff]   ;;  %v1963_v35 = vld [vmem:[#allocation7 + $0x80] sm:$0xff]   ;;  %vm471_vm13 = vmand %vm470_vm9, %vm74_vm2  ;;  %p1746_p2 = scmp.ne.s32.totalorder %s1332_s19, %s1745_s20  ;;  %p1751_p4 = scmp.lt.s32.totalorder %s1745_s20, %s1745_s20 }
  0x39   :  { %154 = vst [vmem:[#allocation2 + $0x10] sm:$0x3] %v153_v52 }
  0x3a   :  { %p1752_p5 = por %p1751_p4, %p1750_p3 }
  0x3c   :  { %v155_v53 = vld [vmem:[#allocation2] sm:$0xf]  ;;  %v156_v54 = vld [vmem:[#allocation2 + $0x4] sm:$0xf]  ;;  %p1753_p6 = pnand %p1752_p5, %p1746_p2 }
  0x3d   :  { %v340_v55 = vld [vmem:[#allocation2] sm:$0xe]  ;;  %v1348_v56 = vcombine.low %v155_v53, %v156_v54 }
  0x3e   :  { %v1359_v58 = vcombine.low %v340_v55, %v156_v54 }
  0x3f   :  { %v1636_v59 = vld [vmem:[#allocation2 + $0x8] sm:$0xff]   ;;  %v179_v60 = vshrl.u32 %v1348_v56, 16  ;;  %v181_v61 = vshll.u32 %v1348_v56, 16  ;;  %1541 = vmatmul.mubr.msk.bf16.vlgmr.msra.gmra.mrb[0].mxu1 %vm201_vm10, %v1348_v56 }
  0x40   :  { %1544 = vmatprep.mubr.msk.bf16.mxu1 %vm1779_vm4, %v1777_v0  ;;  %v1637_v62 = vld [vmem:[#allocation2 + $0x10] ss:$0 sps:$4 sm:$0x77]   ;;  %v186_v1 = vshll.u32 %v1636_v59, 16  ;;  %v190_v3 = vshrl.u32 %v1636_v59, 16  ;;  %v347_v5 = vrot.slane %v1359_v58, 1  ;;  %1567 = vmatpush3.bf16.msra.mxu1 %v1642_v21 }
  0x41   :  { %v183_v63 = vrot.slane %v181_v61, 1  ;;  %v194_v4 = vshll.u32 %v1637_v62, 16  ;;  %v348_v8 = vrot.slane %v1636_v59, 1  ;;  %v198_v10 = vshrl.u32 %v1637_v62, 16  ;;  %1568 = vmatprep.subr.bf16.mxu1 %v1644_v23 }
  0x42   :  { %v188_v7 = vrot.slane %v186_v1, 1  ;;  %v1638_v13 = vld [vmem:[#allocation2 + $0x10] ss:$0 sps:$4 sm:$0x33]   ;;  %v350_v17 = vrot.slane %v1637_v62, 1 }
  0x43   :  { %v184_v6 = vor.u32 %v183_v63, %v179_v60  ;;  %v196_v9 = vrot.slane %v194_v4, 1  ;;  %v349_v16 = vsel %vm346_vm6, %v347_v5, %v348_v8 }
  0x44   :  { %v192_v12 = vor.u32 %v190_v3, %v188_v7  ;;  %v351_v18 = vsel %vm346_vm6, %v348_v8, %v350_v17  ;;  %1569 = vmatpush3.bf16.msra.mxu1 %v1644_v23  ;;  %v1363_v3 = vld [vmem:[%s1997_s2] ss:$0 sm:$0xff] }
  0x45   :  { %v189_v11 = vsel %vm177_vm0, %v184_v6, %v188_v7  ;;  %v200_v15 = vor.u32 %v198_v10, %v196_v9 }
  0x46   :  { %1527 = vmatmul.mubr.msk.bf16.vlgmr.msra.gmra.mrb[0].mxu0 %vm201_vm10, %v189_v11  ;;  %v197_v14 = vsel %vm177_vm0, %v192_v12, %v196_v9 }
  0x47   :  { %1553 = vmatpush3.bf16.msra.mxu0 %v362_v2  ;;  %1530 = vmatprep.mubr.msk.bf16.mxu0 %vm1779_vm4, %v1777_v0 }
  0x48   :  { %1545 = vmatmul.mubr.msk.bf16.gmra.mrb[4].mxu1 %vm201_vm10, %v1636_v59  ;;  %1586 = vmatprep.subr.bf16.mxu0 %v1640_v19 }
  0x49   :  { %1548 = vmatprep.mubr.msk.bf16.mxu1 %vm1779_vm4, %v1777_v0 }
  0x4e   :  { %1531 = vmatmul.mubr.msk.bf16.gmra.mrb[4].mxu0 %vm201_vm10, %v197_v14 }
  0x4f   :  { %1534 = vmatprep.mubr.msk.bf16.mxu0 %vm1779_vm4, %v1777_v0 }
  0x50   :  { %1549 = vmatmul.mubr.msk.bf16.gmra.mrb[8].mxu1 %vm201_vm10, %v1638_v13 }
  0x56   :  { %1535 = vmatmul.mubr.msk.bf16.gmra.mrb[8].mxu0 %vm201_vm10, %v200_v15 }
  0x57   :  { %1554 = vmatprep.mubr.msk.bf16.mxu0 %vm1779_vm4, %v1777_v0 }
  0x5e   :  { %1555 = vmatmul.mubr.msk.bf16.vlgmr.msra.gmra.mrb[12].mxu0 %vm201_vm10, %v349_v16 }
  0x5f   :  { %1558 = vmatprep.mubr.msk.bf16.mxu0 %vm1779_vm4, %v1777_v0  ;;  %1587 = vmatpush3.bf16.msra.mxu0 %v1640_v19 }
  0x60   :  { %1588 = vmatprep.subr.bf16.mxu0 %v1641_v20 }
  0x63   :  { %1589 = vmatpush3.bf16.msra.mxu0 %v1641_v20 }
  0x64   :  { %1590 = vmatprep.subr.bf16.mxu0 %v1643_v22 }
  0x66   :  { %1559 = vmatmul.mubr.msk.bf16.gmra.mrb[16].mxu0 %vm201_vm10, %v351_v18 }
  0x67   :  { %1562 = vmatprep.mubr.msk.bf16.mxu0 %vm1779_vm4, %v1777_v0  ;;  %1591 = vmatpush3.bf16.msra.mxu0 %v1643_v22  ;;  %v1646_v0 = vld [vmem:[#allocation7 + $0x50] sm:$0xff]   ;;  %vm465_vm4 = vcmask 1043456  }
  0x68   :  { %1592 = vmatprep.subr.bf16.mxu0 %v1645_v25  ;;  %1570 = vmatprep.subr.bf16.mxu1 %v1646_v0  ;;  %vm466_vm11 = vmand %vm465_vm4, %vm98_vm5 }
  0x69   :  { %1571 = vmatpush3.bf16.msra.mxu1 %v1646_v0  ;;  %vm496_vm5 = vmand %vm495_vm14, %vm144_vm12 }
  0x6a   :  { %1572 = vmatprep.subr.bf16.mxu1 %v1648_v27 }
  0x6b   :  { %1593 = vmatpush3.bf16.msra.mxu0 %v1645_v25 }
  0x6c   :  { %1594 = vmatprep.subr.bf16.mxu0 %v1647_v26 }
  0x6d   :  { %1573 = vmatpush3.bf16.msra.mxu1 %v1648_v27 }
  0x6e   :  { %1563 = vmatmul.mubr.msk.bf16.gmra.mrb[20].mxu0 %vm201_vm10, %v350_v17  ;;  %1574 = vmatprep.subr.bf16.mxu1 %v1650_v29 }
  0x6f   :  { %1595 = vmatpush3.bf16.msra.mxu0 %v1647_v26 }
  0x70   :  { %1596 = vmatprep.subr.bf16.mxu0 %v1649_v28 }
  0x71   :  { %1575 = vmatpush3.bf16.msra.mxu1 %v1650_v29 }
  0x72   :  { %1576 = vmatprep.subr.bf16.mxu1 %v1652_v31 }
  0x73   :  { %1597 = vmatpush3.bf16.msra.mxu0 %v1649_v28 }
  0x74   :  { %1598 = vmatprep.subr.bf16.mxu0 %v1651_v30 }
  0x75   :  { %1577 = vmatpush3.bf16.msra.mxu1 %v1652_v31 }
  0x76   :  { %1578 = vmatprep.subr.bf16.mxu1 %v1654_v33 }
  0x77   :  { %1599 = vmatpush3.bf16.msra.mxu0 %v1651_v30 }
  0x78   :  { %1600 = vmatprep.subr.bf16.mxu0 %v1653_v32 }
  0x79   :  { %1579 = vmatpush3.bf16.msra.mxu1 %v1654_v33 }
  0x7a   :  { %1580 = vmatprep.subr.bf16.mxu1 %v1658_v34 }
  0x7b   :  { %1601 = vmatpush3.bf16.msra.mxu0 %v1653_v32 }
  0x7d   :  { %1581 = vmatpush3.bf16.msra.mxu1 %v1658_v34 }
  0x7e   :  { %1606 = vmatprep.subr.bf16.mxu1 %v1963_v35 }
 0x112   :  { %v318_v36 = vpop.f32.mrb[0].mxu1 }
 0x113   :  { %v1542_v37 = vpop.f32.mrb[1].mxu1 }
 0x114   :  { %v321_v38 = vpop.f32.mrb[2].mxu1 }
 0x115   :  { %v1543_v39 = vpop.f32.mrb[3].mxu1 }
 0x116   :  { %v472_v39 = vld [vmem:[#allocation3 + $0x4] sm:$0x1] }
 0x119   :  { %v249_v40 = vpop.f32.mrb[0].mxu0 }
 0x11a   :  { %v319_v41 = vadd.f32 %v318_v36, %v249_v40  ;;  %v1528_v42 = vpop.f32.mrb[1].mxu0 }
 0x11b   :  { %v252_v43 = vpop.f32.mrb[2].mxu0  ;;  %v326_v44 = vpop.f32.mrb[4].mxu1 }
 0x11c   :  { %v322_v45 = vadd.f32 %v321_v38, %v252_v43  ;;  %v1529_v46 = vpop.f32.mrb[3].mxu0  ;;  %v1546_v47 = vpop.f32.mrb[5].mxu1  ;;  %v467_v38 = vld [vmem:[#allocation3] sm:$0xf] }
 0x11d   :  { %v329_v48 = vpop.f32.mrb[6].mxu1 }
 0x11e   :  { %v1547_v49 = vpop.f32.mrb[7].mxu1 }
 0x121   :  { %v257_v50 = vpop.f32.mrb[4].mxu0 }
 0x122   :  { %v327_v51 = vadd.f32 %v326_v44, %v257_v50  ;;  %v1532_v52 = vpop.f32.mrb[5].mxu0 }
 0x123   :  { %v260_v53 = vpop.f32.mrb[6].mxu0  ;;  %v334_v54 = vpop.f32.mrb[8].mxu1  ;;  %v497_v52 = vld [vmem:[#allocation3 + $0x4] sm:$0xe] }
 0x124   :  { %v330_v55 = vadd.f32 %v329_v48, %v260_v53  ;;  %v1533_v56 = vpop.f32.mrb[7].mxu0  ;;  %v1550_v57 = vpop.f32.mrb[9].mxu1 }
 0x125   :  { %v337_v58 = vpop.f32.mrb[10].mxu1 }
 0x126   :  { %v1551_v59 = vpop.f32.mrb[11].mxu1 }
 0x129   :  { %v265_v60 = vpop.f32.mrb[8].mxu0 }
 0x12a   :  { %v335_v61 = vadd.f32 %v334_v54, %v265_v60  ;;  %v1536_v62 = vpop.f32.mrb[9].mxu0  ;;  %v502_v54 = vld [vmem:[#allocation3 + $0x8] sm:$0x3] }
 0x12b   :  { %v268_v63 = vpop.f32.mrb[10].mxu0 }
 0x12c   :  { %v1537_v1 = vpop.f32.mrb[11].mxu0 }
 0x131   :  { %v398_v2 = vpop.f32.mrb[12].mxu0 }
 0x132   :  { %v420_v4 = vadd.f32 %v398_v2, %v319_v41  ;;  %v1556_v5 = vpop.f32.mrb[13].mxu0 }
 0x133   :  { %v401_v6 = vpop.f32.mrb[14].mxu0 }
 0x134   :  { %v432_v7 = vadd.f32 %v1363_v3, %v420_v4  ;;  %v421_v8 = vadd.f32 %v401_v6, %v322_v45  ;;  %v1557_v9 = vpop.f32.mrb[15].mxu0 }
 0x136   :  { %v437_v10 = vmax.f32 %v432_v7, 0.0  ;;  %v433_v11 = vadd.f32 %v1363_v3, %v421_v8 }
 0x138   :  { %442 = vst [vmem:[#allocation4] sm:$0xff] %v437_v10  ;;  %v438_v12 = vmax.f32 %v433_v11, 0.0 }
 0x139   :  { %v406_v13 = vpop.f32.mrb[16].mxu0 }
 0x13a   :  { %443 = vst [vmem:[#allocation4 + $0x8] sm:$0xff] %v438_v12  ;;  %v422_v14 = vadd.f32 %v406_v13, %v327_v51  ;;  %v1560_v15 = vpop.f32.mrb[17].mxu0  ;;  %v1661_v12 = vld [vmem:[#allocation7 + $0x88] sm:$0xff]  }
 0x13b   :  { %v409_v16 = vpop.f32.mrb[18].mxu0  ;;  %v1663_v15 = vld [vmem:[#allocation7 + $0x98] sm:$0xff]  }
 0x13c   :  { %v434_v17 = vadd.f32 %v1363_v3, %v422_v14  ;;  %v423_v18 = vadd.f32 %v409_v16, %v330_v55  ;;  %v1561_v19 = vpop.f32.mrb[19].mxu0  ;;  %v1662_v14 = vld [vmem:[#allocation7 + $0x90] sm:$0xff]   ;;  %v1664_v16 = vld [vmem:[#allocation7 + $0xa0] sm:$0xff]  }
 0x13d   :  { %v1667_v19 = vld [vmem:[#allocation7 + $0xb8] sm:$0xff]  }
 0x13e   :  { %v439_v20 = vmax.f32 %v434_v17, 0.0  ;;  %v435_v21 = vadd.f32 %v1363_v3, %v423_v18  ;;  %v1665_v17 = vld [vmem:[#allocation7 + $0xa8] sm:$0xff]   ;;  %v1666_v18 = vld [vmem:[#allocation7 + $0xb0] sm:$0xff]  }
 0x140   :  { %444 = vst [vmem:[#allocation4 + $0x10] sm:$0xff] %v439_v20  ;;  %v440_v22 = vmax.f32 %v435_v21, 0.0  ;;  %v1669_v20 = vld [vmem:[#allocation10] sm:$0xff]  }
 0x141   :  { %v447_v23 = vld [vmem:[#allocation4] ss:$2 sm:$0xff]  ;;  %v449_v25 = vld [vmem:[#allocation4 + $0x1] ss:$2 sm:$0xff]  ;;  %v414_v0 = vpop.f32.mrb[20].mxu0 }
 0x142   :  { %v450_v26 = vmax.f32 %v447_v23, %v449_v25  ;;  %445 = vst [vmem:[#allocation4 + $0x18] sm:$0xff] %v440_v22  ;;  %v424_v27 = vadd.f32 %v414_v0, %v335_v61  ;;  %v1564_v28 = vpop.f32.mrb[21].mxu0  ;;  %v1670_v21 = vld [vmem:[#allocation10 + $0xc0] sm:$0xff]   ;;  %v1672_v23 = vld [vmem:[#allocation10 + $0x48] sm:$0xff]  }
 0x143   :  { %v417_v29 = vpop.f32.mrb[22].mxu0  ;;  %v1671_v22 = vld [vmem:[#allocation10 + $0x80] sm:$0xff]   ;;  %v1673_v25 = vld [vmem:[#allocation10 + $0x8] sm:$0xff]   ;;  %v1678_v28 = vld [vmem:[#allocation10 + $0xd0] sm:$0xff]  }
 0x144   :  { %v1436_v30 = vpack.c.bf16 %v450_v26, %v450_v26  ;;  %v436_v31 = vadd.f32 %v1363_v3, %v424_v27  ;;  %v1565_v32 = vpop.f32.mrb[23].mxu0  ;;  %v1674_v0 = vld [vmem:[#allocation10 + $0xc8] sm:$0xff]   ;;  %v1676_v26 = vld [vmem:[#allocation10 + $0x50] sm:$0xff]  }
 0x145   :  { %v1675_v27 = vld [vmem:[#allocation10 + $0x88] sm:$0xff]   ;;  %v1677_v29 = vld [vmem:[#allocation10 + $0x10] sm:$0xff]   ;;  %v1682_v32 = vld [vmem:[#allocation10 + $0xd8] sm:$0xff]  }
 0x146   :  { %v456_v33 = vshrl.u32 %v1436_v30, 16  ;;  %v441_v34 = vmax.f32 %v436_v31, 0.0  ;;  %v459_v37 = vshll.u32 %v1436_v30, 16  ;;  %v1680_v30 = vld [vmem:[#allocation10 + $0x58] sm:$0xff]   ;;  %v1679_v31 = vld [vmem:[#allocation10 + $0x90] sm:$0xff]  }
 0x148   :  { %v458_v36 = vrot.slane %v456_v33, 7  ;;  %446 = vst [vmem:[#allocation4 + $0x20] sm:$0xf] %v441_v34  ;;  %v1681_v33 = vld [vmem:[#allocation10 + $0x18] sm:$0xff]   ;;  %v1684_v34 = vld [vmem:[#allocation10 + $0x60] sm:$0xff]  }
 0x14a   :  { %v461_v40 = vor.u32 %v459_v37, %v458_v36  ;;  %v462_v41 = vrot.slane %v458_v36, 4  ;;  %v1683_v36 = vld [vmem:[#allocation10 + $0x98] sm:$0xff]   ;;  %v1686_v37 = vld [vmem:[#allocation10 + $0xe0] sm:$0xff]  }
 0x14c   :  { %v468_v42 = vsel %vm466_vm11, %v461_v40, %v467_v38  ;;  %v473_v43 = vsel %vm471_vm13, %v462_v41, %v472_v39  ;;  %v1685_v38 = vld [vmem:[#allocation10 + $0x20] sm:$0xff]   ;;  %v1688_v39 = vld [vmem:[#allocation10 + $0x68] sm:$0xff]  }
 0x14d   :  { %469 = vst [vmem:[#allocation3] sm:$0xf] %v468_v42  ;;  %474 = vst [vmem:[#allocation3 + $0x4] sm:$0x1] %v473_v43  ;;  %v1687_v40 = vld [vmem:[#allocation10 + $0xa0] sm:$0xff]   ;;  %v1690_v41 = vld [vmem:[#allocation10 + $0xe8] sm:$0xff]  }
 0x14e   :  { %v1689_v42 = vld [vmem:[#allocation10 + $0x28] sm:$0xff]   ;;  %v1692_v43 = vld [vmem:[#allocation10 + $0x70] sm:$0xff]  }
 0x14f   :  { %v476_v44 = vld [vmem:[#allocation4 + $0x12] ss:$2 sm:$0xff]  ;;  %v478_v45 = vld [vmem:[#allocation4 + $0x13] ss:$2 sm:$0xff] }
 0x150   :  { %v479_v46 = vmax.f32 %v476_v44, %v478_v45  ;;  %v1691_v44 = vld [vmem:[#allocation10 + $0xa8] sm:$0xff]   ;;  %v1694_v45 = vld [vmem:[#allocation10 + $0xf0] sm:$0xff]  }
 0x152   :  { %v1437_v47 = vpack.c.bf16 %v479_v46, %v479_v46  ;;  %v1693_v46 = vld [vmem:[#allocation10 + $0x30] sm:$0xff]  }
 0x154   :  { %v485_v48 = vshrl.u32 %v1437_v47, 16  ;;  %v488_v49 = vshll.u32 %v1437_v47, 16  ;;  %v505_v58 = vld [vmem:[#allocation3] sm:$0xf]  ;;  %v1696_v47 = vld [vmem:[#allocation10 + $0x78] sm:$0xff]  }
 0x155   :  { %v764_v61 = vld [vmem:[#allocation3] sm:$0xe] }
 0x156   :  { %v487_v50 = vrot.slane %v485_v48, 6  ;;  %v490_v51 = vrot.slane %v488_v49, 7  ;;  %v1695_v48 = vld [vmem:[#allocation10 + $0xb0] sm:$0xff]   ;;  %v1698_v49 = vld [vmem:[#allocation10 + $0xf8] sm:$0xff]  }
 0x158   :  { %v491_v53 = vor.u32 %v490_v51, %v487_v50  ;;  %v1697_v50 = vld [vmem:[#allocation10 + $0x38] sm:$0xff]  }
 0x159   :  { %v1699_v51 = vld [vmem:[#allocation10 + $0xb8] sm:$0xff]  }
 0x15a   :  { %v492_v55 = vrot.slane %v491_v53, 4  ;;  %v498_v56 = vsel %vm496_vm5, %v491_v53, %v497_v52 }
 0x15b   :  { %499 = vst [vmem:[#allocation3 + $0x4] sm:$0xe] %v498_v56 }
 0x15c   :  { %v503_v57 = vsel %vm1890_vm1, %v492_v55, %v502_v54 }
 0x15d   :  { %504 = vst [vmem:[#allocation3 + $0x8] sm:$0x3] %v503_v57 }
 0x162   :  { %v506_v59 = vld [vmem:[#allocation3 + $0x4] sm:$0xf] }
 0x163   :  { %v1366_v60 = vcombine.low %v505_v58, %v506_v59  ;;  %v1385_v62 = vcombine.low %v764_v61, %v506_v59 }
 0x164   :  { %v1657_v63 = vld [vmem:[#allocation3 + $0x8] ss:$0 sps:$4 sm:$0x33]  }
 0x165   :  { %v553_v1 = vshll.u32 %v1366_v60, 16  ;;  %1602 = vmatprep.mubr.bf16.mxu0 %v1366_v60  ;;  %v1659_v2 = vld [vmem:[#allocation3 + $0x8] ss:$0 sps:$4 sm:$0x77]   ;;  %v551_v3 = vshrl.u32 %v1366_v60, 16  ;;  %v785_v6 = vrot.slane %v1385_v62, 1 }
 0x166   :  { %1603 = vmatmul.mubr.bf16.vlgmr.msra.gmra.mrb[24].mxu0 %v1657_v63  ;;  %v558_v5 = vshll.u32 %v1659_v2, 16  ;;  %v562_v9 = vshrl.u32 %v1659_v2, 16  ;;  %v786_v24 = vrot.slane %v1659_v2, 1 }
 0x167   :  { %v555_v4 = vrot.slane %v553_v1, 1  ;;  %v1394_v1 = vld [vmem:[%s1999_s4] ss:$0 sm:$0xff] }
 0x168   :  { %v560_v8 = vrot.slane %v558_v5, 1  ;;  %v787_v13 = vsel %vm346_vm6, %v785_v6, %v786_v24 }
 0x169   :  { %v556_v7 = vor.u32 %v555_v4, %v551_v3 }
 0x16a   :  { %v564_v11 = vor.u32 %v562_v9, %v560_v8 }
 0x16b   :  { %v561_v10 = vsel %vm177_vm0, %v556_v7, %v560_v8 }
 0x16c   :  { %1582 = vmatprep.mubr.bf16.mxu1 %v561_v10 }
 0x16d   :  { %1583 = vmatmul.mubr.bf16.vlgmr.msra.gmra.mrb[12].mxu1 %v564_v11 }
 0x16e   :  { %1607 = vmatpush3.bf16.msra.mxu1 %v1963_v35  ;;  %1622 = vmatprep.mubr.bf16.mxu1 %v787_v13  ;;  %v1668_v35 = vld [vmem:[#allocation10 + $0x40] sm:$0xff]  }
 0x16f   :  { %1608 = vmatprep.subr.bf16.mxu1 %v1661_v12  ;;  %1480 = vmatprep.subr.bf16.mxu0 %v1668_v35 }
 0x170   :  { %1481 = vmatpush3.bf16.msra.mxu0 %v1669_v20 }
 0x171   :  { %1482 = vmatprep.subr.bf16.mxu0 %v1672_v23 }
 0x172   :  { %1609 = vmatpush3.bf16.msra.mxu1 %v1661_v12  ;;  %v1780_v12 = vmov 1983009808  }
 0x173   :  { %1610 = vmatprep.subr.bf16.mxu1 %v1662_v14  ;;  %v912_v13 = vunpack.c.l.s4 %v1780_v12 }
 0x174   :  { %1483 = vmatpush3.bf16.msra.mxu0 %v1673_v25 }
 0x175   :  { %1484 = vmatprep.subr.bf16.mxu0 %v1676_v26 }
 0x176   :  { %1611 = vmatpush3.bf16.msra.mxu1 %v1662_v14  ;;  %v914_v14 = vlaneseq }
 0x177   :  { %1612 = vmatprep.subr.bf16.mxu1 %v1663_v15 }
 0x178   :  { %1485 = vmatpush3.bf16.msra.mxu0 %v1677_v29 }
 0x179   :  { %1486 = vmatprep.subr.bf16.mxu0 %v1680_v30 }
 0x17a   :  { %1613 = vmatpush3.bf16.msra.mxu1 %v1663_v15 }
 0x17b   :  { %1614 = vmatprep.subr.bf16.mxu1 %v1664_v16 }
 0x17c   :  { %1487 = vmatpush3.bf16.msra.mxu0 %v1681_v33 }
 0x17d   :  { %1488 = vmatprep.subr.bf16.mxu0 %v1684_v34 }
 0x17e   :  { %1615 = vmatpush3.bf16.msra.mxu1 %v1664_v16  ;;  %v913_v16 = vunpack.c.0.s8 %v912_v13 }
 0x17f   :  { %1616 = vmatprep.subr.bf16.mxu1 %v1665_v17 }
 0x180   :  { %1489 = vmatpush3.bf16.msra.mxu0 %v1685_v38 }
 0x181   :  { %1490 = vmatprep.subr.bf16.mxu0 %v1688_v39 }
 0x182   :  { %1617 = vmatpush3.bf16.msra.mxu1 %v1665_v17  ;;  %v915_v17 = vshrl.u32 %v914_v14, 7 }
 0x183   :  { %1618 = vmatprep.subr.bf16.mxu1 %v1666_v18 }
 0x184   :  { %1491 = vmatpush3.bf16.msra.mxu0 %v1689_v42 }
 0x185   :  { %1492 = vmatprep.subr.bf16.mxu0 %v1692_v43 }
 0x186   :  { %1619 = vmatpush3.bf16.msra.mxu1 %v1666_v18  ;;  %v916_v18 = vsub.s32 %v913_v16, %v915_v17 }
 0x187   :  { %1620 = vmatprep.subr.bf16.mxu1 %v1667_v19 }
 0x188   :  { %1493 = vmatpush3.bf16.msra.mxu0 %v1693_v46 }
 0x189   :  { %1494 = vmatprep.subr.bf16.mxu0 %v1696_v47 }
 0x18a   :  { %1621 = vmatpush3.bf16.msra.mxu1 %v1667_v19 }
 0x18b   :  { %1502 = vmatprep.subr.bf16.mxu1 %v1670_v21 }
 0x18c   :  { %1495 = vmatpush3.bf16.msra.mxu0 %v1697_v50 }
 0x18d   :  { %1623 = vmatmul.mubr.bf16.vlgmr.msra.gmra.mrb[16].mxu1 %v786_v24 }
 0x18e   :  { %1503 = vmatpush3.bf16.msra.mxu1 %v1671_v22 }
 0x18f   :  { %1504 = vmatprep.subr.bf16.mxu1 %v1674_v0 }
 0x192   :  { %1505 = vmatpush3.bf16.msra.mxu1 %v1675_v27 }
 0x193   :  { %1506 = vmatprep.subr.bf16.mxu1 %v1678_v28 }
 0x196   :  { %1507 = vmatpush3.bf16.msra.mxu1 %v1679_v31 }
 0x197   :  { %1508 = vmatprep.subr.bf16.mxu1 %v1682_v32 }
 0x19a   :  { %1509 = vmatpush3.bf16.msra.mxu1 %v1683_v36 }
 0x19b   :  { %1510 = vmatprep.subr.bf16.mxu1 %v1686_v37 }
 0x19e   :  { %1511 = vmatpush3.bf16.msra.mxu1 %v1687_v40 }
 0x19f   :  { %1512 = vmatprep.subr.bf16.mxu1 %v1690_v41 }
 0x1a2   :  { %1513 = vmatpush3.bf16.msra.mxu1 %v1691_v44  ;;  %v1399_v44 = vld [vmem:[%s2001_s6] ss:$0 sm:$0xff] }
 0x1a3   :  { %1514 = vmatprep.subr.bf16.mxu1 %v1694_v45 }
 0x1a6   :  { %1515 = vmatpush3.bf16.msra.mxu1 %v1695_v48 }
 0x1a7   :  { %1516 = vmatprep.subr.bf16.mxu1 %v1698_v49 }
 0x1aa   :  { %1517 = vmatpush3.bf16.msra.mxu1 %v1699_v51 }
 0x239   :  { %v1604_v52 = vpop.f32.mrb[24].mxu0 }
 0x23a   :  { %v750_v53 = vpop.f32.mrb[25].mxu0 }
 0x23b   :  { %v1605_v54 = vpop.f32.mrb[26].mxu0 }
 0x23c   :  { %v753_v55 = vpop.f32.mrb[27].mxu0 }
 0x240   :  { %v1584_v56 = vpop.f32.mrb[12].mxu1 }
 0x241   :  { %v759_v57 = vadd.f32 %v1604_v52, %v1584_v56  ;;  %v649_v58 = vpop.f32.mrb[13].mxu1 }
 0x242   :  { %v751_v59 = vadd.f32 %v750_v53, %v649_v58  ;;  %v1585_v60 = vpop.f32.mrb[14].mxu1 }
 0x243   :  { %v652_v61 = vpop.f32.mrb[15].mxu1 }
 0x244   :  { %v754_v62 = vadd.f32 %v753_v55, %v652_v61 }
 0x260   :  { %v1624_v63 = vpop.f32.mrb[16].mxu1 }
 0x261   :  { %v888_v2 = vadd.f32 %v1624_v63, %v759_v57  ;;  %v872_v3 = vpop.f32.mrb[17].mxu1 }
 0x262   :  { %v886_v4 = vadd.f32 %v872_v3, %v751_v59  ;;  %v1625_v5 = vpop.f32.mrb[18].mxu1 }
 0x263   :  { %v898_v6 = vadd.f32 %v1394_v1, %v888_v2  ;;  %v875_v7 = vpop.f32.mrb[19].mxu1 }
 0x264   :  { %v896_v8 = vadd.f32 %v1394_v1, %v886_v4  ;;  %v887_v9 = vadd.f32 %v875_v7, %v754_v62 }
 0x265   :  { %v901_v24 = vmax.f32 %v898_v6, 0.0 }
 0x266   :  { %v899_v10 = vmax.f32 %v896_v8, 0.0  ;;  %v897_v11 = vadd.f32 %v1394_v1, %v887_v9 }
 0x267   :  { %904 = vst [vmem:[#allocation5 + $0x10] sm:$0xf] %v901_v24 }
 0x268   :  { %902 = vst [vmem:[#allocation5] sm:$0xff] %v899_v10  ;;  %v900_v15 = vmax.f32 %v897_v11, 0.0 }
 0x26a   :  { %903 = vst [vmem:[#allocation5 + $0x8] sm:$0xff] %v900_v15 }
 0x26f   :  { %v905_v19 = vld [vmem:[#allocation5] ss:$2 sm:$0xf]  ;;  %v907_v35 = vld [vmem:[#allocation5 + $0x1] ss:$2 sm:$0xf] }
 0x270   :  { %v908_v20 = vmax.f32 %v905_v19, %v907_v35 }
 0x271   :  { %v930_v21 = vld [vmem:[#allocation5 + $0xa] ss:$2 sm:$0xf]  ;;  %v932_v22 = vld [vmem:[#allocation5 + $0xb] ss:$2 sm:$0xf] }
 0x272   :  { %909 = vst [vmem:[#allocation6] sm:$0x1] %v908_v20  ;;  %v917_v23 = vrot.slane %v908_v20, %v916_v18  ;;  %v933_v25 = vmax.f32 %v930_v21, %v932_v22 }
 0x274   :  { %v1395_v0 = vrot.slane %v917_v23, 9  ;;  %v922_v26 = vcombine.high %v917_v23, %v917_v23  ;;  %934 = vst [vmem:[#allocation6 + $0x1] sm:$0x1] %v933_v25  ;;  %v942_v27 = vrot.slane %v933_v25, %v916_v18 }
 0x276   :  { %921 = vst [vmem:[#allocation6 + $0x2] sm:$0x1] %v1395_v0  ;;  %924 = vst [vmem:[#allocation6 + $0x4] sm:$0x1] %v922_v26  ;;  %v1396_v28 = vrot.slane %v922_v26, 9  ;;  %v1397_v29 = vrot.slane %v942_v27, 9  ;;  %v947_v30 = vcombine.high %v942_v27, %v942_v27 }
 0x278   :  { %928 = vst [vmem:[#allocation6 + $0x6] sm:$0x1] %v1396_v28  ;;  %946 = vst [vmem:[#allocation6 + $0x3] sm:$0x1] %v1397_v29  ;;  %v1398_v31 = vrot.slane %v947_v30, 9 }
 0x279   :  { %949 = vst [vmem:[#allocation6 + $0x5] sm:$0x1] %v947_v30 }
 0x27a   :  { %953 = vst [vmem:[#allocation6 + $0x7] sm:$0x1] %v1398_v31 }
 0x281   :  { %v954_v32 = vld [vmem:[#allocation6] sm:$0xff] }
 0x282   :  { %v963_v33 = vrot.slane %v954_v32, %v916_v18  ;;  %v956_v34 = vcombine.high %v954_v32, %v954_v32 }
 0x284   :  { %v971_v36 = vcombine.high %v963_v33, %v963_v33  ;;  %v970_v37 = vrot.slane %v956_v34, %v916_v18  ;;  %v977_v40 = vpack.c.bf16 %v963_v33, %v963_v33 }
 0x286   :  { %v978_v38 = vpack.c.bf16 %v971_v36, %v971_v36  ;;  %v972_v39 = vcombine.high %v970_v37, %v970_v37  ;;  %v979_v42 = vpack.c.bf16 %v970_v37, %v970_v37 }
 0x288   :  { %1276 = vmatprep.mubr.bf16.mxu0 %v978_v38  ;;  %v980_v41 = vpack.c.bf16 %v972_v39, %v972_v39 }
 0x289   :  { %1277 = vmatmul.mubr.bf16.vlgmr.msra.gmra.mrb[28].mxu0 %v977_v40 }
 0x28a   :  { %1316 = vmatprep.mubr.bf16.mxu1 %v980_v41 }
 0x28b   :  { %1317 = vmatmul.mubr.bf16.vlgmr.msra.gmra.mrb[20].mxu1 %v979_v42 }
 0x35c   :  { %v1496_v43 = vpop.f32.mrb[28].mxu0 }
 0x35d   :  { %v1497_v45 = vpop.f32.mrb[29].mxu0 }
 0x35e   :  { %v1498_v46 = vadd.f32 %v1497_v45, %v1496_v43  ;;  %v1499_v47 = vpop.f32.mrb[30].mxu0  ;;  %v1518_v48 = vpop.f32.mrb[20].mxu1 }
 0x35f   :  { %v1500_v49 = vpop.f32.mrb[31].mxu0  ;;  %v1519_v50 = vpop.f32.mrb[21].mxu1 }
 0x360   :  { %v1279_v51 = vadd.f32 %v1498_v46, %v1399_v44  ;;  %v1520_v52 = vadd.f32 %v1519_v50, %v1518_v48  ;;  %v1521_v53 = vpop.f32.mrb[22].mxu1 }
 0x361   :  { %v1522_v54 = vpop.f32.mrb[23].mxu1 }
 0x362   :  { %v1319_v55 = vadd.f32 %v1520_v52, %v1279_v51 }
 0x364   :  { %1324 = vst [vmem:[#allocation12] sm:$0x3] %v1319_v55 }
 0x365   :  { %1756 = shalt.err (!%p1753_p6)
}
 0x366   :  { %s1757_s22 = scalar_lea.hbm %s2002_s7, 32 }
 0x367   :  { %p1758_p7 = scmp.ne.s32.totalorder %s2002_s7, %s1757_s22  ;;  %p1761_p8 = scmp.lt.u32.totalorder %s1757_s22, %s2002_s7 }
 0x369   :  { %p1763_p9 = pnand %p1761_p8, %p1758_p7 }
 0x36b   :  { %1766 = shalt.err (!%p1763_p9)
}
 0x36c   :  { %1334 = dma.vmem_to_hbm [thread:$0]  %s1332_s19, 32, %s2002_s7, [#allocation9]  }
 0x36d   :  { %1771 = dma.done.wait [#allocation9], 32  }
 0x36e   :  { %1772 = vsyncadd [#allocation9], 4294967264 }
 0x36f   :  { %1338 = vsyncpa [#allocation8], 1 }
 0x370   :  { %1339 = vsyncpa [#allocation11], 1 }
 0x371   :  { %1340 = vsyncpa [#allocation9], 1 }

</bundles_post_ra>
